<compile_context>
chip_gen: v7x
topology: tpu7x:2x2x1
jax: 0.10.0
libtpu: 0.0.40
codegen_flags: <defaults>
</compile_context>

<pallas_src>
import math
from functools import partial

import jax
import jax.numpy as jnp
from jax import lax
from jax.experimental import pallas as pl
from jax.experimental.pallas import tpu as pltpu

_VMEM_LIMIT = 48 * 1024 * 1024  # stays under v7x's 64 MiB physical VMEM


def _round_up(x, m):
    return (x + m - 1) // m * m


def _apply_act(y, act):
    if act == "relu":
        return jnp.maximum(y, 0.0)
    if act == "sigmoid":
        return jax.nn.sigmoid(y)
    return y


# ------------------------------ Pallas kernels -------------------------------

def _make_mm_kernel(act):
    # A (tm,tk) bf16, B (tk,tn) bf16, bias (1,tn) f32, O (tm,tn) f32.
    # The output block doubles as the fp32 accumulator (block index constant
    # across the k grid axis), so no VMEM scratch is needed.
    def kernel(a_ref, b_ref, bias_ref, o_ref):
        @pl.when(pl.program_id(2) == 0)
        def _init():
            o_ref[...] = jnp.zeros_like(o_ref)

        o_ref[...] += jnp.dot(a_ref[...], b_ref[...],
                              preferred_element_type=jnp.float32)

        @pl.when(pl.program_id(2) == pl.num_programs(2) - 1)
        def _fin():
            y = o_ref[...] + bias_ref[...]
            if act == "relu":
                y = jnp.maximum(y, 0.0)
            elif act == "sigmoid":
                y = jax.nn.sigmoid(y)
            o_ref[...] = y

    return kernel


_MM_KERNELS = {a: _make_mm_kernel(a) for a in ("none", "relu", "sigmoid")}


def _gmm_kernel(a_ref, b_ref, o_ref):
    # grouped matmul: one (tm,kp) x (kp,np) product per (group, m-tile) cell
    o_ref[...] = jnp.dot(a_ref[...], b_ref[...],
                         preferred_element_type=jnp.float32)


def _make_ew_kernel(act):
    def kernel(x_ref, s_ref, b_ref, o_ref):
        y = x_ref[...] * s_ref[...] + b_ref[...]
        if act == "relu":
            y = jnp.maximum(y, 0.0)
        elif act == "sigmoid":
            y = jax.nn.sigmoid(y)
        o_ref[...] = y

    return kernel


_EW_KERNELS = {a: _make_ew_kernel(a) for a in ("none", "relu", "sigmoid")}


def _bn_stats_kernel(x_ref, sum_ref, sq_ref):
    @pl.when(pl.program_id(1) == 0)
    def _init():
        sum_ref[...] = jnp.zeros_like(sum_ref)
        sq_ref[...] = jnp.zeros_like(sq_ref)

    x = x_ref[...]
    sum_ref[...] += jnp.sum(x, axis=0, keepdims=True)
    sq_ref[...] += jnp.sum(x * x, axis=0, keepdims=True)


# ------------------------------ Pallas wrappers -------------------------------

@partial(jax.jit, static_argnames=("act",))
def pallas_matmul(a, b, bias=None, act="none"):
    """act(a @ b + bias); bf16 MXU inputs, fp32 accumulation and output."""
    m, k = a.shape
    _, n = b.shape
    if m < 16 or n < 16:
        # tiny matmuls (CBAM FCs, global-pool 1x1 conv, Cout=1 convs): plain XLA
        y = jnp.dot(a.astype(jnp.float32), b.astype(jnp.float32))
        if bias is not None:
            y = y + bias.astype(jnp.float32)
        return _apply_act(y, act)
    tm = min(512, _round_up(m, 128))
    tn = min(256, _round_up(n, 128))
    tk = min(512, _round_up(k, 128))
    mp, kp, np_ = _round_up(m, tm), _round_up(k, tk), _round_up(n, tn)
    a_p = jnp.pad(a.astype(jnp.bfloat16), ((0, mp - m), (0, kp - k)))
    b_p = jnp.pad(b.astype(jnp.bfloat16), ((0, kp - k), (0, np_ - n)))
    if bias is None:
        bias_p = jnp.zeros((1, np_), jnp.float32)
    else:
        bias_p = jnp.pad(bias.astype(jnp.float32), (0, np_ - n)).reshape(1, np_)
    grid = (mp // tm, np_ // tn, kp // tk)
    out = pl.pallas_call(
        _MM_KERNELS[act],
        out_shape=jax.ShapeDtypeStruct((mp, np_), jnp.float32),
        grid=grid,
        in_specs=[
            pl.BlockSpec((tm, tk), lambda i, j, kk: (i, kk)),
            pl.BlockSpec((tk, tn), lambda i, j, kk: (kk, j)),
            pl.BlockSpec((1, tn), lambda i, j, kk: (0, j)),
        ],
        out_specs=pl.BlockSpec((tm, tn), lambda i, j, kk: (i, j)),
        compiler_params=pltpu.CompilerParams(
            dimension_semantics=("parallel", "parallel", "arbitrary"),
            vmem_limit_bytes=_VMEM_LIMIT),
    )(a_p, b_p, bias_p)
    if mp == m and np_ == n:
        return out
    return out[:m, :n]


@jax.jit
def pallas_grouped_matmul(a, b):
    """Per-group matmul a:(G,M,Kg) x b:(G,Kg,Ng) -> (G,M,Ng) fp32 (bf16 MXU)."""
    g, m, kg = a.shape
    _, _, ng = b.shape
    if m < 16:
        return jnp.einsum("gmk,gkn->gmn",
                          a.astype(jnp.float32), b.astype(jnp.float32))
    tm = min(512, _round_up(m, 128))
    kp = _round_up(kg, 128)
    np_ = _round_up(ng, 128)
    mp = _round_up(m, tm)
    a_p = jnp.pad(a.astype(jnp.bfloat16), ((0, 0), (0, mp - m), (0, kp - kg)))
    b_p = jnp.pad(b.astype(jnp.bfloat16), ((0, 0), (0, kp - kg), (0, np_ - ng)))
    out = pl.pallas_call(
        _gmm_kernel,
        out_shape=jax.ShapeDtypeStruct((g, mp, np_), jnp.float32),
        grid=(g, mp // tm),
        in_specs=[
            pl.BlockSpec((None, tm, kp), lambda gi, i: (gi, i, 0)),
            pl.BlockSpec((None, kp, np_), lambda gi, i: (gi, 0, 0)),
        ],
        out_specs=pl.BlockSpec((None, tm, np_), lambda gi, i: (gi, i, 0)),
        compiler_params=pltpu.CompilerParams(
            dimension_semantics=("parallel", "parallel"),
            vmem_limit_bytes=_VMEM_LIMIT),
    )(a_p, b_p)
    if mp == m and np_ == ng:
        return out
    return out[:, :m, :ng]


@partial(jax.jit, static_argnames=("act",))
def pallas_scale_bias_act(x, scale, bias, act="none"):
    """act(x * scale + bias) with per-column scale/bias; x:(M,C) fp32."""
    m, c = x.shape
    tm = min(512, _round_up(m, 128))
    tn = min(512, _round_up(c, 128))
    mp, cp = _round_up(m, tm), _round_up(c, tn)
    x_p = jnp.pad(x.astype(jnp.float32), ((0, mp - m), (0, cp - c)))
    s_p = jnp.pad(scale.astype(jnp.float32), (0, cp - c)).reshape(1, cp)
    b_p = jnp.pad(bias.astype(jnp.float32), (0, cp - c)).reshape(1, cp)
    out = pl.pallas_call(
        _EW_KERNELS[act],
        out_shape=jax.ShapeDtypeStruct((mp, cp), jnp.float32),
        grid=(mp // tm, cp // tn),
        in_specs=[
            pl.BlockSpec((tm, tn), lambda i, j: (i, j)),
            pl.BlockSpec((1, tn), lambda i, j: (0, j)),
            pl.BlockSpec((1, tn), lambda i, j: (0, j)),
        ],
        out_specs=pl.BlockSpec((tm, tn), lambda i, j: (i, j)),
        compiler_params=pltpu.CompilerParams(
            dimension_semantics=("parallel", "parallel"),
            vmem_limit_bytes=_VMEM_LIMIT),
    )(x_p, s_p, b_p)
    if mp == m and cp == c:
        return out
    return out[:m, :c]


@jax.jit
def pallas_bn_stats(x):
    """Per-column (sum, sum of squares) over rows in one pass; x:(M,C)."""
    m, c = x.shape
    tm = min(512, _round_up(m, 128))
    tn = min(512, _round_up(c, 128))
    mp, cp = _round_up(m, tm), _round_up(c, tn)
    x_p = jnp.pad(x.astype(jnp.float32), ((0, mp - m), (0, cp - c)))
    s, sq = pl.pallas_call(
        _bn_stats_kernel,
        out_shape=(jax.ShapeDtypeStruct((1, cp), jnp.float32),
                   jax.ShapeDtypeStruct((1, cp), jnp.float32)),
        grid=(cp // tn, mp // tm),
        in_specs=[pl.BlockSpec((tm, tn), lambda j, i: (i, j))],
        out_specs=(pl.BlockSpec((1, tn), lambda j, i: (0, j)),
                   pl.BlockSpec((1, tn), lambda j, i: (0, j))),
        compiler_params=pltpu.CompilerParams(
            dimension_semantics=("parallel", "arbitrary"),
            vmem_limit_bytes=_VMEM_LIMIT),
    )(x_p)
    return s[0, :c], sq[0, :c]


# ------------------------------- layer glue ----------------------------------
# Everything below operates on NHWC tensors; NCHW only at the module boundary.

def _extract_patches(x, kh, kw, stride, padding, dilation):
    """x: NHWC -> (N, OH, OW, KH*KW, C) patch tensor (same dtype as x)."""
    n, h, w, c = x.shape
    if padding > 0:
        x = jnp.pad(x, ((0, 0), (padding, padding), (padding, padding), (0, 0)))
    hp, wp = h + 2 * padding, w + 2 * padding
    oh = (hp - dilation * (kh - 1) - 1) // stride + 1
    ow = (wp - dilation * (kw - 1) - 1) // stride + 1
    pats = []
    for i in range(kh):
        for j in range(kw):
            pats.append(
                x[:, i * dilation: i * dilation + (oh - 1) * stride + 1: stride,
                     j * dilation: j * dilation + (ow - 1) * stride + 1: stride, :])
    return jnp.stack(pats, axis=3), oh, ow


def conv2d(x, wm, kh, kw, bias=None, stride=1, padding=0, dilation=1, act="none"):
    """x: NHWC; wm: (kh*kw*Cin, Cout) (block-diagonal for small grouped convs)."""
    n, h, w, c = x.shape
    xb = x.astype(jnp.bfloat16)
    if kh == 1 and kw == 1 and padding == 0:
        if stride > 1:
            xb = xb[:, ::stride, ::stride, :]
        oh, ow = xb.shape[1], xb.shape[2]
        patches = xb.reshape(n * oh * ow, c)
    else:
        # TODO(synk): im2col is still materialized in HBM (in bf16); a fully
        # implicit-GEMM conv (DMAing shifted windows per K-step) would remove
        # the remaining 9x patch traffic of 3x3 convs.
        p5, oh, ow = _extract_patches(xb, kh, kw, stride, padding, dilation)
        patches = p5.reshape(n * oh * ow, kh * kw * c)
    out = pallas_matmul(patches, wm, bias=bias, act=act)
    return out.reshape(n, oh, ow, wm.shape[1])


def conv2d_grouped(x, gw, kh, kw, stride=1, padding=0, dilation=1, groups=1):
    """Grouped conv via per-group matmul; x NHWC, gw (G, kh*kw*Cg, Ng)."""
    n, h, w, c = x.shape
    cg = c // groups
    ng = gw.shape[2]
    xb = x.astype(jnp.bfloat16)
    p5, oh, ow = _extract_patches(xb, kh, kw, stride, padding, dilation)
    m = n * oh * ow
    a = p5.reshape(m, kh * kw, groups, cg)
    a = jnp.transpose(a, (2, 0, 1, 3)).reshape(groups, m, kh * kw * cg)
    out = pallas_grouped_matmul(a, gw)                      # (G, M, Ng) fp32
    out = jnp.transpose(out, (1, 0, 2)).reshape(n, oh, ow, groups * ng)
    return out


def batchnorm2d(x, gamma, beta, act="none", eps=1e-5):
    """Training-mode BatchNorm2d (biased batch stats over N,H,W); x NHWC."""
    n, h, w, c = x.shape
    xr = x.reshape(-1, c)
    m = xr.shape[0]
    if m < 128:
        mean = jnp.mean(xr, axis=0)
        var = jnp.mean(jnp.square(xr - mean), axis=0)
        scale = gamma * lax.rsqrt(var + eps)
        shift = beta - mean * scale
        return _apply_act(xr * scale + shift, act).reshape(n, h, w, c)
    s, sq = pallas_bn_stats(xr)
    mean = s / m
    var = jnp.maximum(sq / m - mean * mean, 0.0)
    scale = gamma * lax.rsqrt(var + eps)
    shift = beta - mean * scale
    y = pallas_scale_bias_act(xr, scale, shift, act=act)
    return y.reshape(n, h, w, c)


def maxpool2d_3x3_s2_p1(x):
    return lax.reduce_window(x, -jnp.inf, lax.max, (1, 3, 3, 1), (1, 2, 2, 1),
                             [(0, 0), (1, 1), (1, 1), (0, 0)])


def pixel_shuffle(x, r):
    n, h, w, c = x.shape
    co = c // (r * r)
    x = x.reshape(n, h, w, co, r, r)
    x = jnp.transpose(x, (0, 1, 4, 2, 5, 3))
    return x.reshape(n, h * r, w * r, co)


def bilinear_resize(x, oh, ow, align_corners=False):
    n, h, w, c = x.shape
    if h == oh and w == ow:
        return x

    def src_idx(osz, isz):
        o = jnp.arange(osz, dtype=jnp.float32)
        if align_corners:
            s = o * ((isz - 1) / (osz - 1)) if osz > 1 else jnp.zeros_like(o)
        else:
            s = jnp.maximum((o + 0.5) * (isz / osz) - 0.5, 0.0)
        i0 = jnp.clip(jnp.floor(s).astype(jnp.int32), 0, isz - 1)
        i1 = jnp.minimum(i0 + 1, isz - 1)
        f = s - i0.astype(jnp.float32)
        return i0, i1, f

    h0, h1, fh = src_idx(oh, h)
    w0, w1, fw = src_idx(ow, w)
    xa = x[:, h0, :, :]
    xb = x[:, h1, :, :]
    xh = xa * (1.0 - fh)[None, :, None, None] + xb * fh[None, :, None, None]
    xaw = xh[:, :, w0, :]
    xbw = xh[:, :, w1, :]
    return xaw * (1.0 - fw)[None, None, :, None] + xbw * fw[None, None, :, None]


# ------------------------------- parameters ----------------------------------

class ParamRNG:
    def __init__(self, seed):
        self._key = jax.random.PRNGKey(seed)
        self._n = 0

    def next(self):
        self._n += 1
        return jax.random.fold_in(self._key, self._n)


def w_to_mat(w, groups):
    """(Cout, Cin/g, kh, kw) -> block-diagonal (kh*kw*Cin, Cout)."""
    cout, cing, kh, kw = w.shape
    cin = cing * groups
    cpg = cout // groups
    m = jnp.zeros((kh, kw, cin, cout), dtype=w.dtype)
    for g in range(groups):
        wg = jnp.transpose(w[g * cpg:(g + 1) * cpg], (2, 3, 1, 0))
        m = m.at[:, :, g * cing:(g + 1) * cing, g * cpg:(g + 1) * cpg].set(wg)
    return m.reshape(kh * kw * cin, cout)


def w_to_grouped(w, groups):
    """(Cout, Cin/g, kh, kw) -> (G, kh*kw*Cin/g, Cout/g) per-group matrices."""
    cout, cing, kh, kw = w.shape
    ng = cout // groups
    w = w.reshape(groups, ng, cing, kh, kw)
    w = jnp.transpose(w, (0, 3, 4, 2, 1))        # (g, kh, kw, cing, ng)
    return w.reshape(groups, kh * kw * cing, ng)


def init_conv(rng, cin, cout, k, stride=1, padding=0, dilation=1, groups=1,
              bias=False):
    fan_in = (cin // groups) * k * k
    w = jax.random.normal(rng.next(), (cout, cin // groups, k, k),
                          jnp.float32) * math.sqrt(2.0 / fan_in)
    b = (0.01 * jax.random.normal(rng.next(), (cout,), jnp.float32)) if bias else None
    p = dict(b=b, k=k, stride=stride, padding=padding, dilation=dilation,
             groups=groups)
    if groups > 1 and (cout // groups) >= 16:
        p["gw"] = w_to_grouped(w, groups)        # group-aware matmul path
    else:
        p["wm"] = w_to_mat(w, groups)            # dense (or small block-diag)
    return p


def apply_conv(p, x, act="none"):
    if "gw" in p:
        y = conv2d_grouped(x, p["gw"], p["k"], p["k"], stride=p["stride"],
                           padding=p["padding"], dilation=p["dilation"],
                           groups=p["groups"])
        if p["b"] is not None:
            y = y + p["b"]
        return _apply_act(y, act)
    return conv2d(x, p["wm"], p["k"], p["k"], bias=p["b"], stride=p["stride"],
                  padding=p["padding"], dilation=p["dilation"], act=act)


def init_bn(c):
    return dict(gamma=jnp.ones((c,), jnp.float32), beta=jnp.zeros((c,), jnp.float32))


def apply_bn(p, x, act="none"):
    return batchnorm2d(x, p["gamma"], p["beta"], act=act)


def init_linear(rng, cin, cout):
    w = jax.random.normal(rng.next(), (cin, cout), jnp.float32) * math.sqrt(2.0 / cin)
    b = 0.01 * jax.random.normal(rng.next(), (cout,), jnp.float32)
    return dict(w=w, b=b)


def apply_linear(p, x, act="none"):
    return pallas_matmul(x, p["w"], bias=p["b"], act=act)


# ---------------------------- ResNeXt50 encoder -------------------------------

def init_bottleneck(rng, inplanes, planes, stride, downsample, groups=32, base_width=4):
    width = int(planes * (base_width / 64.0)) * groups
    p = dict(
        conv1=init_conv(rng, inplanes, width, 1),
        bn1=init_bn(width),
        conv2=init_conv(rng, width, width, 3, stride=stride, padding=1, groups=groups),
        bn2=init_bn(width),
        conv3=init_conv(rng, width, planes * 4, 1),
        bn3=init_bn(planes * 4),
    )
    if downsample:
        p["ds_conv"] = init_conv(rng, inplanes, planes * 4, 1, stride=stride)
        p["ds_bn"] = init_bn(planes * 4)
    return p


def apply_bottleneck(p, x):
    idt = x
    out = apply_bn(p["bn1"], apply_conv(p["conv1"], x), act="relu")
    out = apply_bn(p["bn2"], apply_conv(p["conv2"], out), act="relu")
    out = apply_bn(p["bn3"], apply_conv(p["conv3"], out), act="none")
    if "ds_conv" in p:
        idt = apply_bn(p["ds_bn"], apply_conv(p["ds_conv"], idt), act="none")
    return jnp.maximum(out + idt, 0.0)


def init_layer(rng, inplanes, planes, blocks, stride):
    params = [init_bottleneck(rng, inplanes, planes, stride, downsample=True)]
    for _ in range(blocks - 1):
        params.append(init_bottleneck(rng, planes * 4, planes, 1, downsample=False))
    return params


def apply_layer(params, x):
    for blk in params:
        x = apply_bottleneck(blk, x)
    return x


# ----------------------------------- ASPP -------------------------------------

def init_asppmodule(rng, inplanes, planes, k, padding, dilation, groups=1):
    return dict(conv=init_conv(rng, inplanes, planes, k, padding=padding,
                               dilation=dilation, groups=groups),
                bn=init_bn(planes))


def apply_asppmodule(p, x):
    return apply_bn(p["bn"], apply_conv(p["conv"], x), act="relu")


def init_aspp(rng, inplanes, mid_c, dilations, out_c):
    aspps = [init_asppmodule(rng, inplanes, mid_c, 1, 0, 1, 1)]
    for d in dilations:
        aspps.append(init_asppmodule(rng, inplanes, mid_c, 3, d, d, 4))
    return dict(
        aspps=aspps,
        gp_conv=init_conv(rng, inplanes, mid_c, 1),
        gp_bn=init_bn(mid_c),
        out_conv=init_conv(rng, mid_c * (2 + len(dilations)), out_c, 1),
        out_bn=init_bn(out_c),
    )  # (ASPP.conv1 is unused in the reference forward -> omitted)


def apply_aspp(p, x):
    x0 = jnp.max(x, axis=(1, 2), keepdims=True)               # AdaptiveMaxPool2d((1,1))
    x0 = apply_bn(p["gp_bn"], apply_conv(p["gp_conv"], x0), act="relu")
    xs = [apply_asppmodule(m, x) for m in p["aspps"]]
    oh, ow = xs[0].shape[1], xs[0].shape[2]
    x0 = bilinear_resize(x0, oh, ow, align_corners=True)
    xcat = jnp.concatenate([x0] + xs, axis=3)
    return apply_bn(p["out_bn"], apply_conv(p["out_conv"], xcat), act="relu")


# ----------------------------------- CBAM -------------------------------------

def init_cbam(rng, c, reduction_ratio=16, kernel_size=3):
    mid = int(c / float(reduction_ratio))
    return dict(
        ca_fc1=init_linear(rng, c, mid),
        ca_fc2=init_linear(rng, mid, c),
        sa_conv=init_conv(rng, 2, 1, kernel_size,
                          padding=(kernel_size - 1) // 2, bias=True),
    )


def apply_cbam(p, f):
    # channel attention
    avg = jnp.mean(f, axis=(1, 2))
    mx = jnp.max(f, axis=(1, 2))

    def bneck(v):
        h = apply_linear(p["ca_fc1"], v, act="relu")
        return apply_linear(p["ca_fc2"], h, act="none")

    chan_att = jax.nn.sigmoid(bneck(avg) + bneck(mx))[:, None, None, :]
    fp = chan_att * f
    # spatial attention
    mx_c = jnp.max(fp, axis=3, keepdims=True)
    avg_c = jnp.mean(fp, axis=3, keepdims=True)
    pool = jnp.concatenate([mx_c, avg_c], axis=3)
    spat_att = apply_conv(p["sa_conv"], pool, act="sigmoid")   # broadcast == repeat
    return spat_att * fp


# --------------------------------- UnetBlock ----------------------------------

def init_unetblock(rng, up_in_c, x_in_c, nf):
    return dict(
        shuf_conv=init_conv(rng, up_in_c, (up_in_c // 2) * 4, 1, bias=True),
        bn=init_bn(x_in_c),
        conv1=init_conv(rng, up_in_c // 2 + x_in_c, nf, 3, padding=1, bias=True),
        conv2=init_conv(rng, nf, nf, 3, padding=1, bias=True),
        cbam=init_cbam(rng, nf, 16, 3),
    )


def apply_unetblock(p, up_in, left_in):
    up = apply_conv(p["shuf_conv"], up_in, act="relu")   # PixelShuffle_ICNR conv+ReLU
    up = pixel_shuffle(up, 2)
    s = apply_bn(p["bn"], left_in, act="none")
    cat = jnp.maximum(jnp.concatenate([up, s], axis=3), 0.0)
    x = apply_conv(p["conv1"], cat, act="relu")
    x = apply_cbam(p["cbam"], x)
    return apply_conv(p["conv2"], x, act="relu")


# ------------------------------------ FPN -------------------------------------

def init_fpn(rng, in_chs, out_chs):
    return [dict(c1=init_conv(rng, ic, oc * 2, 3, padding=1, bias=True),
                 bn=init_bn(oc * 2),
                 c2=init_conv(rng, oc * 2, oc, 3, padding=1, bias=True))
            for ic, oc in zip(in_chs, out_chs)]


def apply_fpn(p, xs, last_layer):
    hcs = []
    n = len(p)
    for i, (cp, x) in enumerate(zip(p, xs)):
        h = apply_conv(cp["c1"], x, act="relu")
        h = apply_bn(cp["bn"], h, act="none")
        h = apply_conv(cp["c2"], h, act="none")
        sf = 2 ** (n - i)
        h = bilinear_resize(h, h.shape[1] * sf, h.shape[2] * sf, align_corners=False)
        hcs.append(h)
    hcs.append(last_layer)
    return jnp.concatenate(hcs, axis=3)


# ---------------------------------- UneXt50 -----------------------------------

def init_unext50(rng, stride=1):
    return dict(
        conv1=init_conv(rng, 3, 64, 7, stride=2, padding=3),
        bn1=init_bn(64),
        layer1=init_layer(rng, 64, 64, 3, 1),     # resnext50_32x4d: [3, 4, 6, 3]
        layer2=init_layer(rng, 256, 128, 4, 2),
        layer3=init_layer(rng, 512, 256, 6, 2),
        layer4=init_layer(rng, 1024, 512, 3, 2),
        aspp=init_aspp(rng, 2048, 256,
                       [stride * 1, stride * 2, stride * 3, stride * 4], 512),
        dec4=init_unetblock(rng, 512, 1024, 256),
        dec3=init_unetblock(rng, 256, 512, 128),
        dec2=init_unetblock(rng, 128, 256, 64),
        dec1=init_unetblock(rng, 64, 64, 32),
        fpn=init_fpn(rng, [512, 256, 128, 64], [16] * 4),
        final=init_conv(rng, 32 + 16 * 4, 1, 1, bias=True),
    )


def unext50_forward(p, x):
    x = jnp.transpose(x, (0, 2, 3, 1))                 # NCHW -> NHWC (once)
    enc0 = apply_bn(p["bn1"], apply_conv(p["conv1"], x), act="relu")
    enc1 = apply_layer(p["layer1"], maxpool2d_3x3_s2_p1(enc0))
    enc2 = apply_layer(p["layer2"], enc1)
    enc3 = apply_layer(p["layer3"], enc2)
    enc4 = apply_layer(p["layer4"], enc3)
    enc5 = apply_aspp(p["aspp"], enc4)
    # TODO(synk): Dropout2d(0.5)/Dropout2d(0.1) are stochastic (train mode);
    # applied as deterministic identity (eval semantics) here.
    dec3 = apply_unetblock(p["dec4"], enc5, enc3)
    dec2 = apply_unetblock(p["dec3"], dec3, enc2)
    dec1 = apply_unetblock(p["dec2"], dec2, enc1)
    dec0 = apply_unetblock(p["dec1"], dec1, enc0)
    f = apply_fpn(p["fpn"], [enc5, dec3, dec2, dec1], dec0)
    out = apply_conv(p["final"], f, act="none")
    out = bilinear_resize(out, out.shape[1] * 2, out.shape[2] * 2,
                          align_corners=False)
    return jnp.transpose(out, (0, 3, 1, 2))            # NHWC -> NCHW (once)


if __name__ == "__main__":
    rng = ParamRNG(42)
    params = init_unext50(rng, stride=1)
    x = jax.random.normal(jax.random.PRNGKey(0), (2, 3, 64, 64), jnp.float32)
    out = unext50_forward(params, x)
    out = jax.block_until_ready(out)
    assert out.shape == (2, 1, 64, 64), out.shape
    assert bool(jnp.all(jnp.isfinite(out)))
    print("KERNEL_OK")
</pallas_src>

<mosaic_0001>
module attributes {stable_mosaic.version = 11 : i64} {
  func.func @kernel(%arg0: i32, %arg1: i32, %arg2: i32, %arg3: memref<512x256xbf16, #tpu.memory_space<vmem>>, %arg4: memref<256x128xbf16, #tpu.memory_space<vmem>>, %arg5: memref<1x128xf32, #tpu.memory_space<vmem>>, %arg6: memref<512x128xf32, #tpu.memory_space<vmem>>) attributes {dimension_semantics = [#tpu.dimension_semantics<parallel>, #tpu.dimension_semantics<parallel>, #tpu.dimension_semantics<arbitrary>], iteration_bounds = array<i64: 4, 1, 1>, scalar_prefetch = 0 : i64, scratch_operands = 0 : i64, tpu.core_type = #tpu.core_type<tc>, window_params = [{transform_indices = @transform_0, window_bounds = array<i64: 512, 256>}, {transform_indices = @transform_1, window_bounds = array<i64: 256, 128>}, {transform_indices = @transform_2, window_bounds = array<i64: 1, 128>}, {transform_indices = @transform_3, window_bounds = array<i64: 512, 128>}]} {
    %c0_i32 = arith.constant 0 : i32
    %0 = arith.cmpi eq, %arg2, %c0_i32 : i32
    %1 = arith.extui %0 : i1 to i32
    %c0_i32_0 = arith.constant 0 : i32
    %2 = arith.cmpi ne, %1, %c0_i32_0 : i32
    scf.if %2 {
      %cst_10 = arith.constant 0.000000e+00 : f32
      %12 = vector.broadcast %cst_10 : f32 to vector<512x128xf32>
      %c0_11 = arith.constant 0 : index
      %c0_12 = arith.constant 0 : index
      %13 = vector.load %arg6[%c0_11, %c0_12] : memref<512x128xf32, #tpu.memory_space<vmem>>, vector<512x128xf32>
      tpu.vector_store %arg6[%c0_11, %c0_12], %12 {strides = array<i32>} : memref<512x128xf32, #tpu.memory_space<vmem>>, vector<512x128xf32>,
    } else {
    }
    %c0 = arith.constant 0 : index
    %c0_1 = arith.constant 0 : index
    %3 = vector.load %arg6[%c0, %c0_1] : memref<512x128xf32, #tpu.memory_space<vmem>>, vector<512x128xf32>
    %c0_2 = arith.constant 0 : index
    %c0_3 = arith.constant 0 : index
    %4 = vector.load %arg3[%c0_2, %c0_3] : memref<512x256xbf16, #tpu.memory_space<vmem>>, vector<512x256xbf16>
    %c0_4 = arith.constant 0 : index
    %c0_5 = arith.constant 0 : index
    %5 = vector.load %arg4[%c0_4, %c0_5] : memref<256x128xbf16, #tpu.memory_space<vmem>>, vector<256x128xbf16>
    %cst = arith.constant dense<0.000000e+00> : vector<512x128xf32>
    %6 = tpu.matmul %4, %5, %cst {dimension_numbers = #tpu.dot_dimension_numbers<[1], [0], [0], [1], [0, 0, 1, 1], [], []>} : vector<512x256xbf16>, vector<256x128xbf16>, vector<512x128xf32> -> vector<512x128xf32>
    %7 = arith.addf %3, %6 : vector<512x128xf32>
    %c0_6 = arith.constant 0 : index
    %c0_7 = arith.constant 0 : index
    %8 = vector.load %arg6[%c0_6, %c0_7] : memref<512x128xf32, #tpu.memory_space<vmem>>, vector<512x128xf32>
    tpu.vector_store %arg6[%c0_6, %c0_7], %7 {strides = array<i32>} : memref<512x128xf32, #tpu.memory_space<vmem>>, vector<512x128xf32>,
    %c0_i32_8 = arith.constant 0 : i32
    %9 = arith.cmpi eq, %arg2, %c0_i32_8 : i32
    %10 = arith.extui %9 : i1 to i32
    %c0_i32_9 = arith.constant 0 : i32
    %11 = arith.cmpi ne, %10, %c0_i32_9 : i32
    scf.if %11 {
      %c0_10 = arith.constant 0 : index
      %c0_11 = arith.constant 0 : index
      %12 = vector.load %arg6[%c0_10, %c0_11] : memref<512x128xf32, #tpu.memory_space<vmem>>, vector<512x128xf32>
      %c0_12 = arith.constant 0 : index
      %c0_13 = arith.constant 0 : index
      %13 = vector.load %arg5[%c0_12, %c0_13] : memref<1x128xf32, #tpu.memory_space<vmem>>, vector<1x128xf32>
      %14 = vector.broadcast %13 : vector<1x128xf32> to vector<512x128xf32>
      %15 = arith.addf %12, %14 : vector<512x128xf32>
      %c0_14 = arith.constant 0 : index
      %c0_15 = arith.constant 0 : index
      %16 = vector.load %arg6[%c0_14, %c0_15] : memref<512x128xf32, #tpu.memory_space<vmem>>, vector<512x128xf32>
      tpu.vector_store %arg6[%c0_14, %c0_15], %15 {strides = array<i32>} : memref<512x128xf32, #tpu.memory_space<vmem>>, vector<512x128xf32>,
    } else {
    }
    return
  }
  func.func @transform_0(%arg0: i32, %arg1: i32, %arg2: i32) -> (i32, i32) {
    %c0_i32 = arith.constant 0 : i32
    return %arg0, %arg2 : i32, i32
  }
  func.func @transform_1(%arg0: i32, %arg1: i32, %arg2: i32) -> (i32, i32) {
    %c0_i32 = arith.constant 0 : i32
    return %arg2, %arg1 : i32, i32
  }
  func.func @transform_2(%arg0: i32, %arg1: i32, %arg2: i32) -> (i32, i32) {
    %c0_i32 = arith.constant 0 : i32
    %c0_i32_0 = arith.constant 0 : i32
    return %c0_i32, %arg1 : i32, i32
  }
  func.func @transform_3(%arg0: i32, %arg1: i32, %arg2: i32) -> (i32, i32) {
    %c0_i32 = arith.constant 0 : i32
    return %arg0, %arg1 : i32, i32
  }
}

</mosaic_0001>

<bundles_post_ra>
// kernel: pallas_matmul.1
= control target key start
LH: loop header
LB: loop body
LE: loop exit
PB: predicated region body
PF: predicated region fallthrough
CT: control target
= control target key end

     0   :  { %s1956_s12 = smov 0   ;;  %s1958_s13 = smov 0   ;;  %s2277_s0 = inlined_call_operand.vmem [shape: bf16[2048,256], index: 0, kind: input, shape index: {}]   ;;  %s2278_s1 = inlined_call_operand.vmem [shape: bf16[256,128], index: 1, kind: input, shape index: {}]   ;;  %s2279_s2 = inlined_call_operand.vmem [shape: f32[1,128], index: 2, kind: input, shape index: {}]   ;;  %s2280_s3 = inlined_call_operand.vmem [shape: f32[2048,128], index: 3, kind: output, shape index: {}]  }
   0x1   :  { %s1960_s14 = smov 0  }
   0x2 LB: > { %s32_s15 = sadd.s32 1, %s1929_s13  ;;  %p1651_p0 = scmp.ge.s32.totalorder %s1933_s14, 1  ;;  %s1933_s14 = sphi %s1960_s14, %s13_s14   ;;  %s1929_s13 = sphi %s1958_s13, %s2282_s13   ;;  %s1925_s12 = sphi %s1956_s12, %s2281_s12  }
   0x3   : > { %p34_p1 = scmp.ge.s32.totalorder %s32_s15, 4  ;;  %p191_p2 = scmp.lt.s32.totalorder %s1933_s14, 5 }
   0x5   : > { %s2284_s15 = smov (%p34_p1, %s32_s15), 0  ;;  %p192_p3 = pnand %p1651_p0, %p191_p2 }
   0x6   : > { %v1799_v0 = vld [vmem:[%s2278_s1] sm:$0xff] (!%p192_p3)   ;;  %v1935_v1 = vmov (!%p192_p3), 0   ;;  %s1652_s18 = sshll.u32 (!%p192_p3), %s1925_s12, 6  ;;  %v1800_v2 = vld [vmem:[%s2278_s1 + $0x8] sm:$0xff] (!%p192_p3)   ;;  %v1801_v3 = vld [vmem:[%s2278_s1 + $0x10] sm:$0xff] (!%p192_p3)  }
   0x7   : > { %195 = sbr.rel (%p192_p3) target bundleno = 408 (0x198), region = 32  ;;  %912 = vmatprep.subr.bf16.mxu0 (!%p192_p3), %v1935_v1  ;;  %1741 = vmatprep.subr.bf16.mxu1 (!%p192_p3), %v1935_v1  ;;  %p236_p4 = scmp.lt.s32.totalorder (!%p192_p3), %s1652_s18, 255  ;;  %v1802_v4 = vld [vmem:[%s2278_s1 + $0x18] sm:$0xff] (!%p192_p3)   ;;  %v1803_v5 = vld [vmem:[%s2278_s1 + $0x20] sm:$0xff] (!%p192_p3)   ;;  %v1804_v7 = vld [vmem:[%s2278_s1 + $0x28] sm:$0xff] (!%p192_p3)  }
   0x8   : > { %913 = vmatpush1.bf16.msra.mxu0 (!%p192_p3), %v1799_v0  ;;  %1757 = vmatpush1.bf16.msra.mxu1 (!%p192_p3), %v1799_v0  ;;  %v1805_v9 = vld [vmem:[%s2278_s1 + $0x30] sm:$0xff] (!%p192_p3)   ;;  %v1806_v10 = vld [vmem:[%s2278_s1 + $0x38] sm:$0xff] (!%p192_p3)   ;;  %v1807_v11 = vld [vmem:[%s2278_s1 + $0x40] sm:$0xff] (!%p192_p3)  }
   0x9   : > { %914 = vmatprep.subr.bf16.mxu0 (!%p192_p3), %v1935_v1  ;;  %1742 = vmatprep.subr.bf16.mxu1 (!%p192_p3), %v1935_v1  ;;  %v1808_v12 = vld [vmem:[%s2278_s1 + $0x48] sm:$0xff] (!%p192_p3)   ;;  %v1809_v13 = vld [vmem:[%s2278_s1 + $0x50] sm:$0xff] (!%p192_p3)   ;;  %v1810_v14 = vld [vmem:[%s2278_s1 + $0x58] sm:$0xff] (!%p192_p3)  }
   0xa   : > { %v1811_v15 = vld [vmem:[%s2278_s1 + $0x60] sm:$0xff] (!%p192_p3)   ;;  %v1812_v16 = vld [vmem:[%s2278_s1 + $0x68] sm:$0xff] (!%p192_p3)   ;;  %v1813_v17 = vld [vmem:[%s2278_s1 + $0x70] sm:$0xff] (!%p192_p3)  }
   0xb   : > { %v1814_v18 = vld [vmem:[%s2278_s1 + $0x78] sm:$0xff] (!%p192_p3)  }
   0xc   : > { %915 = vmatpush1.bf16.msra.mxu0 (!%p192_p3), %v1800_v2  ;;  %1758 = vmatpush1.bf16.msra.mxu1 (!%p192_p3), %v1800_v2 }
   0xd   : > { %916 = vmatprep.subr.bf16.mxu0 (!%p192_p3), %v1935_v1  ;;  %1743 = vmatprep.subr.bf16.mxu1 (!%p192_p3), %v1935_v1 }
   0xe   : > { %s2286_s18 = smov (!%p236_p4, %s1652_s18), 255 }
   0xf   : > { %s1740_s25 = sshll.u32 %s2286_s18, 3 }
  0x10   : > { %917 = vmatpush1.bf16.msra.mxu0 %v1801_v3  ;;  %1759 = vmatpush1.bf16.msra.mxu1 %v1801_v3  ;;  %s2005_s30 = scalar_lea.vmem %s2277_s0, %s1740_s25  ;;  %s2138_s9 = scalar_lea.vmem %s2280_s3, %s1740_s25 }
  0x11   : > { %918 = vmatprep.subr.bf16.mxu0 %v1935_v1  ;;  %1744 = vmatprep.subr.bf16.mxu1 %v1935_v1  ;;  %v1817_v6 = vld [vmem:[%s2005_s30 + $0x4] ss:$8 sps:$4 sm:$0xff]   ;;  %v1815_v19 = vld [vmem:[%s2005_s30] ss:$8 sps:$4 sm:$0xff]   ;;  %v1821_v21 = vld [vmem:[%s2005_s30 + $0x14] ss:$8 sps:$4 sm:$0xff]  }
  0x12   : > { %v1820_v8 = vld [vmem:[%s2005_s30 + $0x104] ss:$8 sps:$4 sm:$0xff]   ;;  %944 = vmatprep.mubr.bf16.mxu0 %v1817_v6  ;;  %v1818_v20 = vld [vmem:[%s2005_s30 + $0x100] ss:$8 sps:$4 sm:$0xff]   ;;  %v1823_v22 = vld [vmem:[%s2005_s30 + $0x114] ss:$8 sps:$4 sm:$0xff]  }
  0x13   : > { %1072 = vmatprep.mubr.bf16.mxu1 %v1820_v8  ;;  %v1825_v23 = vld [vmem:[%s2005_s30 + $0x10] ss:$8 sps:$4 sm:$0xff]   ;;  %v1827_v25 = vld [vmem:[%s2005_s30 + $0x24] ss:$8 sps:$4 sm:$0xff]   ;;  %v1831_v27 = vld [vmem:[%s2005_s30 + $0x20] ss:$8 sps:$4 sm:$0xff]  }
  0x14   : > { %919 = vmatpush1.bf16.msra.mxu0 %v1802_v4  ;;  %1760 = vmatpush1.bf16.msra.mxu1 %v1802_v4  ;;  %v1826_v24 = vld [vmem:[%s2005_s30 + $0x110] ss:$8 sps:$4 sm:$0xff]   ;;  %v1829_v26 = vld [vmem:[%s2005_s30 + $0x124] ss:$8 sps:$4 sm:$0xff]   ;;  %v1832_v28 = vld [vmem:[%s2005_s30 + $0x120] ss:$8 sps:$4 sm:$0xff]  }
  0x15   : > { %920 = vmatprep.subr.bf16.mxu0 %v1935_v1  ;;  %1745 = vmatprep.subr.bf16.mxu1 %v1935_v1  ;;  %v1833_v29 = vld [vmem:[%s2005_s30 + $0x34] ss:$8 sps:$4 sm:$0xff]   ;;  %v1837_v31 = vld [vmem:[%s2005_s30 + $0x30] ss:$8 sps:$4 sm:$0xff]   ;;  %v1839_v33 = vld [vmem:[%s2005_s30 + $0x44] ss:$8 sps:$4 sm:$0xff]  }
  0x16   : > { %v1835_v30 = vld [vmem:[%s2005_s30 + $0x134] ss:$8 sps:$4 sm:$0xff]   ;;  %v1838_v32 = vld [vmem:[%s2005_s30 + $0x130] ss:$8 sps:$4 sm:$0xff]   ;;  %v1841_v34 = vld [vmem:[%s2005_s30 + $0x144] ss:$8 sps:$4 sm:$0xff]  }
  0x17   : > { %v1843_v35 = vld [vmem:[%s2005_s30 + $0x40] ss:$8 sps:$4 sm:$0xff]   ;;  %v1845_v37 = vld [vmem:[%s2005_s30 + $0x54] ss:$8 sps:$4 sm:$0xff]   ;;  %v1849_v39 = vld [vmem:[%s2005_s30 + $0x50] ss:$8 sps:$4 sm:$0xff]  }
  0x18   : > { %921 = vmatpush1.bf16.msra.mxu0 %v1803_v5  ;;  %1761 = vmatpush1.bf16.msra.mxu1 %v1803_v5  ;;  %v1844_v36 = vld [vmem:[%s2005_s30 + $0x140] ss:$8 sps:$4 sm:$0xff]   ;;  %v1847_v38 = vld [vmem:[%s2005_s30 + $0x154] ss:$8 sps:$4 sm:$0xff]   ;;  %v1850_v40 = vld [vmem:[%s2005_s30 + $0x150] ss:$8 sps:$4 sm:$0xff]  }
  0x19   : > { %922 = vmatprep.subr.bf16.mxu0 %v1935_v1  ;;  %1746 = vmatprep.subr.bf16.mxu1 %v1935_v1  ;;  %v1851_v41 = vld [vmem:[%s2005_s30 + $0x64] ss:$8 sps:$4 sm:$0xff]   ;;  %v1855_v43 = vld [vmem:[%s2005_s30 + $0x60] ss:$8 sps:$4 sm:$0xff]   ;;  %v1857_v45 = vld [vmem:[%s2005_s30 + $0x74] ss:$8 sps:$4 sm:$0xff]  }
  0x1a   : > { %v1853_v42 = vld [vmem:[%s2005_s30 + $0x164] ss:$8 sps:$4 sm:$0xff]   ;;  %v1856_v44 = vld [vmem:[%s2005_s30 + $0x160] ss:$8 sps:$4 sm:$0xff]   ;;  %v1859_v46 = vld [vmem:[%s2005_s30 + $0x174] ss:$8 sps:$4 sm:$0xff]  }
  0x1b   : > { %v1861_v47 = vld [vmem:[%s2005_s30 + $0x70] ss:$8 sps:$4 sm:$0xff]   ;;  %v1863_v49 = vld [vmem:[%s2005_s30 + $0x84] ss:$8 sps:$4 sm:$0xff]   ;;  %v1867_v51 = vld [vmem:[%s2005_s30 + $0x80] ss:$8 sps:$4 sm:$0xff]  }
  0x1c   : > { %923 = vmatpush1.bf16.msra.mxu0 %v1804_v7  ;;  %1762 = vmatpush1.bf16.msra.mxu1 %v1804_v7  ;;  %v1862_v48 = vld [vmem:[%s2005_s30 + $0x170] ss:$8 sps:$4 sm:$0xff]   ;;  %v1865_v50 = vld [vmem:[%s2005_s30 + $0x184] ss:$8 sps:$4 sm:$0xff]   ;;  %v1868_v52 = vld [vmem:[%s2005_s30 + $0x180] ss:$8 sps:$4 sm:$0xff]  }
  0x1d   : > { %924 = vmatprep.subr.bf16.mxu0 %v1935_v1  ;;  %1747 = vmatprep.subr.bf16.mxu1 %v1935_v1  ;;  %v1869_v53 = vld [vmem:[%s2005_s30 + $0x94] ss:$8 sps:$4 sm:$0xff]   ;;  %v1873_v55 = vld [vmem:[%s2005_s30 + $0x90] ss:$8 sps:$4 sm:$0xff]   ;;  %v1875_v57 = vld [vmem:[%s2005_s30 + $0xa4] ss:$8 sps:$4 sm:$0xff]  }
  0x1e   : > { %v1871_v54 = vld [vmem:[%s2005_s30 + $0x194] ss:$8 sps:$4 sm:$0xff]   ;;  %v1874_v56 = vld [vmem:[%s2005_s30 + $0x190] ss:$8 sps:$4 sm:$0xff]   ;;  %v1877_v58 = vld [vmem:[%s2005_s30 + $0x1a4] ss:$8 sps:$4 sm:$0xff]  }
  0x1f   : > { %v1879_v59 = vld [vmem:[%s2005_s30 + $0xa0] ss:$8 sps:$4 sm:$0xff]   ;;  %v1881_v61 = vld [vmem:[%s2005_s30 + $0xb4] ss:$8 sps:$4 sm:$0xff]   ;;  %v1885_v63 = vld [vmem:[%s2005_s30 + $0xb0] ss:$8 sps:$4 sm:$0xff]  }
  0x20   : > { %925 = vmatpush1.bf16.msra.mxu0 %v1805_v9  ;;  %1763 = vmatpush1.bf16.msra.mxu1 %v1805_v9  ;;  %v1880_v60 = vld [vmem:[%s2005_s30 + $0x1a0] ss:$8 sps:$4 sm:$0xff]   ;;  %v1883_v62 = vld [vmem:[%s2005_s30 + $0x1b4] ss:$8 sps:$4 sm:$0xff]   ;;  %v1886_v0 = vld [vmem:[%s2005_s30 + $0x1b0] ss:$8 sps:$4 sm:$0xff]  }
  0x21   : > { %926 = vmatprep.subr.bf16.mxu0 %v1935_v1  ;;  %1748 = vmatprep.subr.bf16.mxu1 %v1935_v1  ;;  %v1889_v2 = vld [vmem:[%s2005_s30 + $0x1c4] ss:$8 sps:$4 sm:$0xff]   ;;  %v1891_v3 = vld [vmem:[%s2005_s30 + $0xc0] ss:$8 sps:$4 sm:$0xff]   ;;  %v1893_v5 = vld [vmem:[%s2005_s30 + $0xd4] ss:$8 sps:$4 sm:$0xff]  }
  0x22   : > { %v1892_v4 = vld [vmem:[%s2005_s30 + $0x1c0] ss:$8 sps:$4 sm:$0xff]   ;;  %v1895_v6 = vld [vmem:[%s2005_s30 + $0x1d4] ss:$8 sps:$4 sm:$0xff]   ;;  %v1897_v7 = vld [vmem:[%s2005_s30 + $0xd0] ss:$8 sps:$4 sm:$0xff]  }
  0x23   : > { %v1898_v8 = vld [vmem:[%s2005_s30 + $0x1d0] ss:$8 sps:$4 sm:$0xff]   ;;  %v1899_v9 = vld [vmem:[%s2005_s30 + $0xe4] ss:$8 sps:$4 sm:$0xff]  }
  0x24   : > { %927 = vmatpush1.bf16.msra.mxu0 %v1806_v10  ;;  %1764 = vmatpush1.bf16.msra.mxu1 %v1806_v10  ;;  %v1901_v10 = vld [vmem:[%s2005_s30 + $0x1e4] ss:$8 sps:$4 sm:$0xff]  }
  0x25   : > { %928 = vmatprep.subr.bf16.mxu0 %v1935_v1  ;;  %1749 = vmatprep.subr.bf16.mxu1 %v1935_v1 }
  0x28   : > { %929 = vmatpush1.bf16.msra.mxu0 %v1807_v11  ;;  %1765 = vmatpush1.bf16.msra.mxu1 %v1807_v11  ;;  %v1903_v11 = vld [vmem:[%s2005_s30 + $0xe0] ss:$8 sps:$4 sm:$0xff]  }
  0x29   : > { %930 = vmatprep.subr.bf16.mxu0 %v1935_v1  ;;  %1750 = vmatprep.subr.bf16.mxu1 %v1935_v1 }
  0x2c   : > { %931 = vmatpush1.bf16.msra.mxu0 %v1808_v12  ;;  %1766 = vmatpush1.bf16.msra.mxu1 %v1808_v12  ;;  %v1904_v12 = vld [vmem:[%s2005_s30 + $0x1e0] ss:$8 sps:$4 sm:$0xff]  }
  0x2d   : > { %932 = vmatprep.subr.bf16.mxu0 %v1935_v1  ;;  %1751 = vmatprep.subr.bf16.mxu1 %v1935_v1 }
  0x30   : > { %933 = vmatpush1.bf16.msra.mxu0 %v1809_v13  ;;  %1767 = vmatpush1.bf16.msra.mxu1 %v1809_v13  ;;  %v1905_v13 = vld [vmem:[%s2005_s30 + $0xf4] ss:$8 sps:$4 sm:$0xff]  }
  0x31   : > { %934 = vmatprep.subr.bf16.mxu0 %v1935_v1  ;;  %1752 = vmatprep.subr.bf16.mxu1 %v1935_v1 }
  0x34   : > { %935 = vmatpush1.bf16.msra.mxu0 %v1810_v14  ;;  %1768 = vmatpush1.bf16.msra.mxu1 %v1810_v14  ;;  %v1907_v14 = vld [vmem:[%s2005_s30 + $0x1f4] ss:$8 sps:$4 sm:$0xff]  }
  0x35   : > { %936 = vmatprep.subr.bf16.mxu0 %v1935_v1  ;;  %1753 = vmatprep.subr.bf16.mxu1 %v1935_v1 }
  0x38   : > { %937 = vmatpush1.bf16.msra.mxu0 %v1811_v15  ;;  %1769 = vmatpush1.bf16.msra.mxu1 %v1811_v15  ;;  %v1909_v15 = vld [vmem:[%s2005_s30 + $0xf0] ss:$8 sps:$4 sm:$0xff]  }
  0x39   : > { %938 = vmatprep.subr.bf16.mxu0 %v1935_v1  ;;  %1754 = vmatprep.subr.bf16.mxu1 %v1935_v1 }
  0x3c   : > { %939 = vmatpush1.bf16.msra.mxu0 %v1812_v16  ;;  %1770 = vmatpush1.bf16.msra.mxu1 %v1812_v16  ;;  %v1910_v16 = vld [vmem:[%s2005_s30 + $0x1f0] ss:$8 sps:$4 sm:$0xff]  }
  0x3d   : > { %940 = vmatprep.subr.bf16.mxu0 %v1935_v1  ;;  %1755 = vmatprep.subr.bf16.mxu1 %v1935_v1 }
  0x40   : > { %941 = vmatpush1.bf16.msra.mxu0 %v1813_v17  ;;  %1771 = vmatpush1.bf16.msra.mxu1 %v1813_v17 }
  0x41   : > { %942 = vmatprep.subr.bf16.mxu0 %v1935_v1  ;;  %1756 = vmatprep.subr.bf16.mxu1 %v1935_v1  ;;  %v1887_v1 = vld [vmem:[%s2005_s30 + $0xc4] ss:$8 sps:$4 sm:$0xff]  }
  0x44   : > { %943 = vmatpush1.bf16.msra.mxu0 %v1814_v18  ;;  %1772 = vmatpush1.bf16.msra.mxu1 %v1814_v18  ;;  %v2131_v18 = vld [vmem:[%s2279_s2] ss:$0 sm:$0xff] }
  0x47   : > { %945 = vmatmul.mubr.bf16.vlgmr.msra.gmra.mrb[0].mxu0 %v1815_v19  ;;  %1073 = vmatmul.mubr.bf16.vlgmr.msra.gmra.mrb[0].mxu1 %v1818_v20 }
  0x48   : > { %952 = vmatprep.mubr.bf16.mxu0 %v1821_v21  ;;  %1080 = vmatprep.mubr.bf16.mxu1 %v1823_v22 }
  0x4f   : > { %953 = vmatmul.mubr.bf16.gmra.mrb[4].mxu0 %v1825_v23  ;;  %1081 = vmatmul.mubr.bf16.gmra.mrb[4].mxu1 %v1826_v24 }
  0x50   : > { %960 = vmatprep.mubr.bf16.mxu0 %v1827_v25  ;;  %1088 = vmatprep.mubr.bf16.mxu1 %v1829_v26 }
  0x57   : > { %961 = vmatmul.mubr.bf16.gmra.mrb[8].mxu0 %v1831_v27  ;;  %1089 = vmatmul.mubr.bf16.gmra.mrb[8].mxu1 %v1832_v28 }
  0x58   : > { %968 = vmatprep.mubr.bf16.mxu0 %v1833_v29  ;;  %1096 = vmatprep.mubr.bf16.mxu1 %v1835_v30 }
  0x5f   : > { %969 = vmatmul.mubr.bf16.gmra.mrb[12].mxu0 %v1837_v31  ;;  %1097 = vmatmul.mubr.bf16.gmra.mrb[12].mxu1 %v1838_v32 }
  0x60   : > { %976 = vmatprep.mubr.bf16.mxu0 %v1839_v33  ;;  %1104 = vmatprep.mubr.bf16.mxu1 %v1841_v34 }
  0x67   : > { %977 = vmatmul.mubr.bf16.gmra.mrb[16].mxu0 %v1843_v35  ;;  %1105 = vmatmul.mubr.bf16.gmra.mrb[16].mxu1 %v1844_v36 }
  0x68   : > { %984 = vmatprep.mubr.bf16.mxu0 %v1845_v37  ;;  %1112 = vmatprep.mubr.bf16.mxu1 %v1847_v38 }
  0x6f   : > { %985 = vmatmul.mubr.bf16.gmra.mrb[20].mxu0 %v1849_v39  ;;  %1113 = vmatmul.mubr.bf16.gmra.mrb[20].mxu1 %v1850_v40 }
  0x70   : > { %992 = vmatprep.mubr.bf16.mxu0 %v1851_v41  ;;  %1120 = vmatprep.mubr.bf16.mxu1 %v1853_v42 }
  0x77   : > { %993 = vmatmul.mubr.bf16.gmra.mrb[24].mxu0 %v1855_v43  ;;  %1121 = vmatmul.mubr.bf16.gmra.mrb[24].mxu1 %v1856_v44 }
  0x78   : > { %1000 = vmatprep.mubr.bf16.mxu0 %v1857_v45  ;;  %1128 = vmatprep.mubr.bf16.mxu1 %v1859_v46 }
  0x7f   : > { %1001 = vmatmul.mubr.bf16.gmra.mrb[28].mxu0 %v1861_v47  ;;  %1129 = vmatmul.mubr.bf16.gmra.mrb[28].mxu1 %v1862_v48 }
  0x80   : > { %1008 = vmatprep.mubr.bf16.mxu0 %v1863_v49  ;;  %1136 = vmatprep.mubr.bf16.mxu1 %v1865_v50 }
  0x87   : > { %1009 = vmatmul.mubr.bf16.gmra.mrb[32].mxu0 %v1867_v51  ;;  %1137 = vmatmul.mubr.bf16.gmra.mrb[32].mxu1 %v1868_v52 }
  0x88   : > { %1016 = vmatprep.mubr.bf16.mxu0 %v1869_v53  ;;  %1144 = vmatprep.mubr.bf16.mxu1 %v1871_v54 }
  0x8f   : > { %1017 = vmatmul.mubr.bf16.gmra.mrb[36].mxu0 %v1873_v55  ;;  %1145 = vmatmul.mubr.bf16.gmra.mrb[36].mxu1 %v1874_v56 }
  0x90   : > { %1024 = vmatprep.mubr.bf16.mxu0 %v1875_v57  ;;  %1152 = vmatprep.mubr.bf16.mxu1 %v1877_v58 }
  0x97   : > { %1025 = vmatmul.mubr.bf16.gmra.mrb[40].mxu0 %v1879_v59  ;;  %1153 = vmatmul.mubr.bf16.gmra.mrb[40].mxu1 %v1880_v60 }
  0x98   : > { %1032 = vmatprep.mubr.bf16.mxu0 %v1881_v61  ;;  %1160 = vmatprep.mubr.bf16.mxu1 %v1883_v62 }
  0x9f   : > { %1033 = vmatmul.mubr.bf16.gmra.mrb[44].mxu0 %v1885_v63  ;;  %1161 = vmatmul.mubr.bf16.gmra.mrb[44].mxu1 %v1886_v0 }
  0xa0   : > { %1040 = vmatprep.mubr.bf16.mxu0 %v1887_v1  ;;  %1168 = vmatprep.mubr.bf16.mxu1 %v1889_v2 }
  0xa7   : > { %1041 = vmatmul.mubr.bf16.gmra.mrb[48].mxu0 %v1891_v3  ;;  %1169 = vmatmul.mubr.bf16.gmra.mrb[48].mxu1 %v1892_v4 }
  0xa8   : > { %1048 = vmatprep.mubr.bf16.mxu0 %v1893_v5  ;;  %1176 = vmatprep.mubr.bf16.mxu1 %v1895_v6 }
  0xaf   : > { %1049 = vmatmul.mubr.bf16.gmra.mrb[52].mxu0 %v1897_v7  ;;  %1177 = vmatmul.mubr.bf16.gmra.mrb[52].mxu1 %v1898_v8 }
  0xb0   : > { %1056 = vmatprep.mubr.bf16.mxu0 %v1899_v9  ;;  %1184 = vmatprep.mubr.bf16.mxu1 %v1901_v10 }
  0xb7   : > { %1057 = vmatmul.mubr.bf16.gmra.mrb[56].mxu0 %v1903_v11  ;;  %1185 = vmatmul.mubr.bf16.gmra.mrb[56].mxu1 %v1904_v12 }
  0xb8   : > { %1064 = vmatprep.mubr.bf16.mxu0 %v1905_v13  ;;  %1192 = vmatprep.mubr.bf16.mxu1 %v1907_v14 }
  0xbf   : > { %1065 = vmatmul.mubr.bf16.gmra.mrb[60].mxu0 %v1909_v15  ;;  %1193 = vmatmul.mubr.bf16.gmra.mrb[60].mxu1 %v1910_v16 }
 0x11a   : > { %v946_v17 = vpop.f32.mrb[0].mxu0  ;;  %v1074_v19 = vpop.f32.mrb[0].mxu1 }
 0x11b   : > { %v948_v20 = vpop.f32.mrb[1].mxu0  ;;  %v1076_v21 = vpop.f32.mrb[1].mxu1  ;;  %v1403_v24 = vadd.f32 %v2131_v18, %v946_v17  ;;  %v1435_v25 = vadd.f32 %v2131_v18, %v1074_v19 }
 0x11c   : > { %v949_v22 = vpop.f32.mrb[2].mxu0  ;;  %v1077_v23 = vpop.f32.mrb[2].mxu1 }
 0x11d   : > { %v951_v26 = vpop.f32.mrb[3].mxu0  ;;  %v1079_v27 = vpop.f32.mrb[3].mxu1  ;;  %1467 = vst [vmem:[%s2138_s9] sm:$0xff] %v1403_v24  ;;  %1499 = vst [vmem:[%s2138_s9 + $0x100] sm:$0xff] %v1435_v25  ;;  %v1404_v28 = vadd.f32 %v2131_v18, %v949_v22  ;;  %v1436_v29 = vadd.f32 %v2131_v18, %v1077_v23 }
 0x11f   : > { %1468 = vst [vmem:[%s2138_s9 + $0x8] sm:$0xff] %v1404_v28  ;;  %1500 = vst [vmem:[%s2138_s9 + $0x108] sm:$0xff] %v1436_v29 }
 0x122   : > { %v954_v30 = vpop.f32.mrb[4].mxu0  ;;  %v1082_v31 = vpop.f32.mrb[4].mxu1 }
 0x123   : > { %v956_v32 = vpop.f32.mrb[5].mxu0  ;;  %v1084_v33 = vpop.f32.mrb[5].mxu1  ;;  %v1405_v36 = vadd.f32 %v2131_v18, %v954_v30  ;;  %v1437_v37 = vadd.f32 %v2131_v18, %v1082_v31 }
 0x124   : > { %v957_v34 = vpop.f32.mrb[6].mxu0  ;;  %v1085_v35 = vpop.f32.mrb[6].mxu1 }
 0x125   : > { %v959_v38 = vpop.f32.mrb[7].mxu0  ;;  %v1087_v39 = vpop.f32.mrb[7].mxu1  ;;  %1469 = vst [vmem:[%s2138_s9 + $0x10] sm:$0xff] %v1405_v36  ;;  %1501 = vst [vmem:[%s2138_s9 + $0x110] sm:$0xff] %v1437_v37  ;;  %v1406_v40 = vadd.f32 %v2131_v18, %v957_v34  ;;  %v1438_v41 = vadd.f32 %v2131_v18, %v1085_v35 }
 0x127   : > { %1470 = vst [vmem:[%s2138_s9 + $0x18] sm:$0xff] %v1406_v40  ;;  %1502 = vst [vmem:[%s2138_s9 + $0x118] sm:$0xff] %v1438_v41 }
 0x12a   : > { %v962_v42 = vpop.f32.mrb[8].mxu0  ;;  %v1090_v43 = vpop.f32.mrb[8].mxu1 }
 0x12b   : > { %v964_v44 = vpop.f32.mrb[9].mxu0  ;;  %v1092_v45 = vpop.f32.mrb[9].mxu1  ;;  %v1407_v48 = vadd.f32 %v2131_v18, %v962_v42  ;;  %v1439_v49 = vadd.f32 %v2131_v18, %v1090_v43 }
 0x12c   : > { %v965_v46 = vpop.f32.mrb[10].mxu0  ;;  %v1093_v47 = vpop.f32.mrb[10].mxu1 }
 0x12d   : > { %v967_v50 = vpop.f32.mrb[11].mxu0  ;;  %v1095_v51 = vpop.f32.mrb[11].mxu1  ;;  %1471 = vst [vmem:[%s2138_s9 + $0x20] sm:$0xff] %v1407_v48  ;;  %1503 = vst [vmem:[%s2138_s9 + $0x120] sm:$0xff] %v1439_v49  ;;  %v1408_v52 = vadd.f32 %v2131_v18, %v965_v46  ;;  %v1440_v53 = vadd.f32 %v2131_v18, %v1093_v47 }
 0x12f   : > { %1472 = vst [vmem:[%s2138_s9 + $0x28] sm:$0xff] %v1408_v52  ;;  %1504 = vst [vmem:[%s2138_s9 + $0x128] sm:$0xff] %v1440_v53 }
 0x132   : > { %v970_v54 = vpop.f32.mrb[12].mxu0  ;;  %v1098_v55 = vpop.f32.mrb[12].mxu1 }
 0x133   : > { %v972_v56 = vpop.f32.mrb[13].mxu0  ;;  %v1100_v57 = vpop.f32.mrb[13].mxu1  ;;  %v1409_v60 = vadd.f32 %v2131_v18, %v970_v54  ;;  %v1441_v61 = vadd.f32 %v2131_v18, %v1098_v55 }
 0x134   : > { %v973_v58 = vpop.f32.mrb[14].mxu0  ;;  %v1101_v59 = vpop.f32.mrb[14].mxu1 }
 0x135   : > { %v975_v62 = vpop.f32.mrb[15].mxu0  ;;  %v1103_v63 = vpop.f32.mrb[15].mxu1  ;;  %1473 = vst [vmem:[%s2138_s9 + $0x30] sm:$0xff] %v1409_v60  ;;  %1505 = vst [vmem:[%s2138_s9 + $0x130] sm:$0xff] %v1441_v61  ;;  %v1410_v0 = vadd.f32 %v2131_v18, %v973_v58  ;;  %v1442_v1 = vadd.f32 %v2131_v18, %v1101_v59 }
 0x137   : > { %1474 = vst [vmem:[%s2138_s9 + $0x38] sm:$0xff] %v1410_v0  ;;  %1506 = vst [vmem:[%s2138_s9 + $0x138] sm:$0xff] %v1442_v1 }
 0x13a   : > { %v978_v2 = vpop.f32.mrb[16].mxu0  ;;  %v1106_v3 = vpop.f32.mrb[16].mxu1 }
 0x13b   : > { %v980_v4 = vpop.f32.mrb[17].mxu0  ;;  %v1108_v5 = vpop.f32.mrb[17].mxu1  ;;  %v1411_v8 = vadd.f32 %v2131_v18, %v978_v2  ;;  %v1443_v9 = vadd.f32 %v2131_v18, %v1106_v3 }
 0x13c   : > { %v981_v6 = vpop.f32.mrb[18].mxu0  ;;  %v1109_v7 = vpop.f32.mrb[18].mxu1 }
 0x13d   : > { %v983_v10 = vpop.f32.mrb[19].mxu0  ;;  %v1111_v11 = vpop.f32.mrb[19].mxu1  ;;  %1475 = vst [vmem:[%s2138_s9 + $0x40] sm:$0xff] %v1411_v8  ;;  %1507 = vst [vmem:[%s2138_s9 + $0x140] sm:$0xff] %v1443_v9  ;;  %v1412_v12 = vadd.f32 %v2131_v18, %v981_v6  ;;  %v1444_v13 = vadd.f32 %v2131_v18, %v1109_v7 }
 0x13f   : > { %1476 = vst [vmem:[%s2138_s9 + $0x48] sm:$0xff] %v1412_v12  ;;  %1508 = vst [vmem:[%s2138_s9 + $0x148] sm:$0xff] %v1444_v13 }
 0x142   : > { %v986_v14 = vpop.f32.mrb[20].mxu0  ;;  %v1114_v15 = vpop.f32.mrb[20].mxu1 }
 0x143   : > { %v988_v16 = vpop.f32.mrb[21].mxu0  ;;  %v1116_v17 = vpop.f32.mrb[21].mxu1  ;;  %v1413_v21 = vadd.f32 %v2131_v18, %v986_v14  ;;  %v1445_v22 = vadd.f32 %v2131_v18, %v1114_v15 }
 0x144   : > { %v989_v19 = vpop.f32.mrb[22].mxu0  ;;  %v1117_v20 = vpop.f32.mrb[22].mxu1 }
 0x145   : > { %v991_v23 = vpop.f32.mrb[23].mxu0  ;;  %v1119_v24 = vpop.f32.mrb[23].mxu1  ;;  %1477 = vst [vmem:[%s2138_s9 + $0x50] sm:$0xff] %v1413_v21  ;;  %1509 = vst [vmem:[%s2138_s9 + $0x150] sm:$0xff] %v1445_v22  ;;  %v1414_v25 = vadd.f32 %v2131_v18, %v989_v19  ;;  %v1446_v26 = vadd.f32 %v2131_v18, %v1117_v20 }
 0x147   : > { %1478 = vst [vmem:[%s2138_s9 + $0x58] sm:$0xff] %v1414_v25  ;;  %1510 = vst [vmem:[%s2138_s9 + $0x158] sm:$0xff] %v1446_v26 }
 0x14a   : > { %v994_v27 = vpop.f32.mrb[24].mxu0  ;;  %v1122_v28 = vpop.f32.mrb[24].mxu1 }
 0x14b   : > { %v996_v29 = vpop.f32.mrb[25].mxu0  ;;  %v1124_v30 = vpop.f32.mrb[25].mxu1  ;;  %v1415_v33 = vadd.f32 %v2131_v18, %v994_v27  ;;  %v1447_v34 = vadd.f32 %v2131_v18, %v1122_v28 }
 0x14c   : > { %v997_v31 = vpop.f32.mrb[26].mxu0  ;;  %v1125_v32 = vpop.f32.mrb[26].mxu1 }
 0x14d   : > { %v999_v35 = vpop.f32.mrb[27].mxu0  ;;  %v1127_v36 = vpop.f32.mrb[27].mxu1  ;;  %1479 = vst [vmem:[%s2138_s9 + $0x60] sm:$0xff] %v1415_v33  ;;  %1511 = vst [vmem:[%s2138_s9 + $0x160] sm:$0xff] %v1447_v34  ;;  %v1416_v37 = vadd.f32 %v2131_v18, %v997_v31  ;;  %v1448_v38 = vadd.f32 %v2131_v18, %v1125_v32 }
 0x14f   : > { %1480 = vst [vmem:[%s2138_s9 + $0x68] sm:$0xff] %v1416_v37  ;;  %1512 = vst [vmem:[%s2138_s9 + $0x168] sm:$0xff] %v1448_v38 }
 0x152   : > { %v1002_v39 = vpop.f32.mrb[28].mxu0  ;;  %v1130_v40 = vpop.f32.mrb[28].mxu1 }
 0x153   : > { %v1004_v41 = vpop.f32.mrb[29].mxu0  ;;  %v1132_v42 = vpop.f32.mrb[29].mxu1  ;;  %v1417_v45 = vadd.f32 %v2131_v18, %v1002_v39  ;;  %v1449_v46 = vadd.f32 %v2131_v18, %v1130_v40 }
 0x154   : > { %v1005_v43 = vpop.f32.mrb[30].mxu0  ;;  %v1133_v44 = vpop.f32.mrb[30].mxu1 }
 0x155   : > { %v1007_v47 = vpop.f32.mrb[31].mxu0  ;;  %v1135_v48 = vpop.f32.mrb[31].mxu1  ;;  %1481 = vst [vmem:[%s2138_s9 + $0x70] sm:$0xff] %v1417_v45  ;;  %1513 = vst [vmem:[%s2138_s9 + $0x170] sm:$0xff] %v1449_v46  ;;  %v1418_v49 = vadd.f32 %v2131_v18, %v1005_v43  ;;  %v1450_v50 = vadd.f32 %v2131_v18, %v1133_v44 }
 0x157   : > { %1482 = vst [vmem:[%s2138_s9 + $0x78] sm:$0xff] %v1418_v49  ;;  %1514 = vst [vmem:[%s2138_s9 + $0x178] sm:$0xff] %v1450_v50 }
 0x15a   : > { %v1010_v51 = vpop.f32.mrb[32].mxu0  ;;  %v1138_v52 = vpop.f32.mrb[32].mxu1 }
 0x15b   : > { %v1012_v53 = vpop.f32.mrb[33].mxu0  ;;  %v1140_v54 = vpop.f32.mrb[33].mxu1  ;;  %v1419_v57 = vadd.f32 %v2131_v18, %v1010_v51  ;;  %v1451_v58 = vadd.f32 %v2131_v18, %v1138_v52 }
 0x15c   : > { %v1013_v55 = vpop.f32.mrb[34].mxu0  ;;  %v1141_v56 = vpop.f32.mrb[34].mxu1 }
 0x15d   : > { %v1015_v59 = vpop.f32.mrb[35].mxu0  ;;  %v1143_v60 = vpop.f32.mrb[35].mxu1  ;;  %1483 = vst [vmem:[%s2138_s9 + $0x80] sm:$0xff] %v1419_v57  ;;  %1515 = vst [vmem:[%s2138_s9 + $0x180] sm:$0xff] %v1451_v58  ;;  %v1420_v61 = vadd.f32 %v2131_v18, %v1013_v55  ;;  %v1452_v62 = vadd.f32 %v2131_v18, %v1141_v56 }
 0x15f   : > { %1484 = vst [vmem:[%s2138_s9 + $0x88] sm:$0xff] %v1420_v61  ;;  %1516 = vst [vmem:[%s2138_s9 + $0x188] sm:$0xff] %v1452_v62 }
 0x162   : > { %v1018_v63 = vpop.f32.mrb[36].mxu0  ;;  %v1146_v0 = vpop.f32.mrb[36].mxu1 }
 0x163   : > { %v1020_v1 = vpop.f32.mrb[37].mxu0  ;;  %v1148_v2 = vpop.f32.mrb[37].mxu1  ;;  %v1421_v5 = vadd.f32 %v2131_v18, %v1018_v63  ;;  %v1453_v6 = vadd.f32 %v2131_v18, %v1146_v0 }
 0x164   : > { %v1021_v3 = vpop.f32.mrb[38].mxu0  ;;  %v1149_v4 = vpop.f32.mrb[38].mxu1 }
 0x165   : > { %v1023_v7 = vpop.f32.mrb[39].mxu0  ;;  %v1151_v8 = vpop.f32.mrb[39].mxu1  ;;  %1485 = vst [vmem:[%s2138_s9 + $0x90] sm:$0xff] %v1421_v5  ;;  %1517 = vst [vmem:[%s2138_s9 + $0x190] sm:$0xff] %v1453_v6  ;;  %v1422_v9 = vadd.f32 %v2131_v18, %v1021_v3  ;;  %v1454_v10 = vadd.f32 %v2131_v18, %v1149_v4 }
 0x167   : > { %1486 = vst [vmem:[%s2138_s9 + $0x98] sm:$0xff] %v1422_v9  ;;  %1518 = vst [vmem:[%s2138_s9 + $0x198] sm:$0xff] %v1454_v10 }
 0x16a   : > { %v1026_v11 = vpop.f32.mrb[40].mxu0  ;;  %v1154_v12 = vpop.f32.mrb[40].mxu1 }
 0x16b   : > { %v1028_v13 = vpop.f32.mrb[41].mxu0  ;;  %v1156_v14 = vpop.f32.mrb[41].mxu1  ;;  %v1423_v17 = vadd.f32 %v2131_v18, %v1026_v11  ;;  %v1455_v19 = vadd.f32 %v2131_v18, %v1154_v12 }
 0x16c   : > { %v1029_v15 = vpop.f32.mrb[42].mxu0  ;;  %v1157_v16 = vpop.f32.mrb[42].mxu1 }
 0x16d   : > { %v1031_v20 = vpop.f32.mrb[43].mxu0  ;;  %v1159_v21 = vpop.f32.mrb[43].mxu1  ;;  %1487 = vst [vmem:[%s2138_s9 + $0xa0] sm:$0xff] %v1423_v17  ;;  %1519 = vst [vmem:[%s2138_s9 + $0x1a0] sm:$0xff] %v1455_v19  ;;  %v1424_v22 = vadd.f32 %v2131_v18, %v1029_v15  ;;  %v1456_v23 = vadd.f32 %v2131_v18, %v1157_v16 }
 0x16f   : > { %1488 = vst [vmem:[%s2138_s9 + $0xa8] sm:$0xff] %v1424_v22  ;;  %1520 = vst [vmem:[%s2138_s9 + $0x1a8] sm:$0xff] %v1456_v23 }
 0x172   : > { %v1034_v24 = vpop.f32.mrb[44].mxu0  ;;  %v1162_v25 = vpop.f32.mrb[44].mxu1 }
 0x173   : > { %v1036_v26 = vpop.f32.mrb[45].mxu0  ;;  %v1164_v27 = vpop.f32.mrb[45].mxu1  ;;  %v1425_v30 = vadd.f32 %v2131_v18, %v1034_v24  ;;  %v1457_v31 = vadd.f32 %v2131_v18, %v1162_v25 }
 0x174   : > { %v1037_v28 = vpop.f32.mrb[46].mxu0  ;;  %v1165_v29 = vpop.f32.mrb[46].mxu1 }
 0x175   : > { %v1039_v32 = vpop.f32.mrb[47].mxu0  ;;  %v1167_v33 = vpop.f32.mrb[47].mxu1  ;;  %1489 = vst [vmem:[%s2138_s9 + $0xb0] sm:$0xff] %v1425_v30  ;;  %1521 = vst [vmem:[%s2138_s9 + $0x1b0] sm:$0xff] %v1457_v31  ;;  %v1426_v34 = vadd.f32 %v2131_v18, %v1037_v28  ;;  %v1458_v35 = vadd.f32 %v2131_v18, %v1165_v29 }
 0x177   : > { %1490 = vst [vmem:[%s2138_s9 + $0xb8] sm:$0xff] %v1426_v34  ;;  %1522 = vst [vmem:[%s2138_s9 + $0x1b8] sm:$0xff] %v1458_v35 }
 0x17a   : > { %v1042_v36 = vpop.f32.mrb[48].mxu0  ;;  %v1170_v37 = vpop.f32.mrb[48].mxu1 }
 0x17b   : > { %v1044_v38 = vpop.f32.mrb[49].mxu0  ;;  %v1172_v39 = vpop.f32.mrb[49].mxu1  ;;  %v1427_v42 = vadd.f32 %v2131_v18, %v1042_v36  ;;  %v1459_v43 = vadd.f32 %v2131_v18, %v1170_v37 }
 0x17c   : > { %v1045_v40 = vpop.f32.mrb[50].mxu0  ;;  %v1173_v41 = vpop.f32.mrb[50].mxu1 }
 0x17d   : > { %v1047_v44 = vpop.f32.mrb[51].mxu0  ;;  %v1175_v45 = vpop.f32.mrb[51].mxu1  ;;  %1491 = vst [vmem:[%s2138_s9 + $0xc0] sm:$0xff] %v1427_v42  ;;  %1523 = vst [vmem:[%s2138_s9 + $0x1c0] sm:$0xff] %v1459_v43  ;;  %v1428_v46 = vadd.f32 %v2131_v18, %v1045_v40  ;;  %v1460_v47 = vadd.f32 %v2131_v18, %v1173_v41 }
 0x17f   : > { %1492 = vst [vmem:[%s2138_s9 + $0xc8] sm:$0xff] %v1428_v46  ;;  %1524 = vst [vmem:[%s2138_s9 + $0x1c8] sm:$0xff] %v1460_v47 }
 0x182   : > { %v1050_v48 = vpop.f32.mrb[52].mxu0  ;;  %v1178_v49 = vpop.f32.mrb[52].mxu1 }
 0x183   : > { %v1052_v50 = vpop.f32.mrb[53].mxu0  ;;  %v1180_v51 = vpop.f32.mrb[53].mxu1  ;;  %v1429_v54 = vadd.f32 %v2131_v18, %v1050_v48  ;;  %v1461_v55 = vadd.f32 %v2131_v18, %v1178_v49 }
 0x184   : > { %v1053_v52 = vpop.f32.mrb[54].mxu0  ;;  %v1181_v53 = vpop.f32.mrb[54].mxu1 }
 0x185   : > { %v1055_v56 = vpop.f32.mrb[55].mxu0  ;;  %v1183_v57 = vpop.f32.mrb[55].mxu1  ;;  %1493 = vst [vmem:[%s2138_s9 + $0xd0] sm:$0xff] %v1429_v54  ;;  %1525 = vst [vmem:[%s2138_s9 + $0x1d0] sm:$0xff] %v1461_v55  ;;  %v1430_v58 = vadd.f32 %v2131_v18, %v1053_v52  ;;  %v1462_v59 = vadd.f32 %v2131_v18, %v1181_v53 }
 0x187   : > { %1494 = vst [vmem:[%s2138_s9 + $0xd8] sm:$0xff] %v1430_v58  ;;  %1526 = vst [vmem:[%s2138_s9 + $0x1d8] sm:$0xff] %v1462_v59 }
 0x18a   : > { %v1058_v60 = vpop.f32.mrb[56].mxu0  ;;  %v1186_v61 = vpop.f32.mrb[56].mxu1 }
 0x18b   : > { %v1060_v62 = vpop.f32.mrb[57].mxu0  ;;  %v1188_v63 = vpop.f32.mrb[57].mxu1  ;;  %v1431_v2 = vadd.f32 %v2131_v18, %v1058_v60  ;;  %v1463_v3 = vadd.f32 %v2131_v18, %v1186_v61 }
 0x18c   : > { %v1061_v0 = vpop.f32.mrb[58].mxu0  ;;  %v1189_v1 = vpop.f32.mrb[58].mxu1 }
 0x18d   : > { %v1063_v4 = vpop.f32.mrb[59].mxu0  ;;  %v1191_v5 = vpop.f32.mrb[59].mxu1  ;;  %1495 = vst [vmem:[%s2138_s9 + $0xe0] sm:$0xff] %v1431_v2  ;;  %1527 = vst [vmem:[%s2138_s9 + $0x1e0] sm:$0xff] %v1463_v3  ;;  %v1432_v6 = vadd.f32 %v2131_v18, %v1061_v0  ;;  %v1464_v7 = vadd.f32 %v2131_v18, %v1189_v1 }
 0x18f   : > { %1496 = vst [vmem:[%s2138_s9 + $0xe8] sm:$0xff] %v1432_v6  ;;  %1528 = vst [vmem:[%s2138_s9 + $0x1e8] sm:$0xff] %v1464_v7 }
 0x192   : > { %v1066_v8 = vpop.f32.mrb[60].mxu0  ;;  %v1194_v9 = vpop.f32.mrb[60].mxu1 }
 0x193   : > { %v1068_v10 = vpop.f32.mrb[61].mxu0  ;;  %v1196_v11 = vpop.f32.mrb[61].mxu1  ;;  %v1433_v14 = vadd.f32 %v2131_v18, %v1066_v8  ;;  %v1465_v15 = vadd.f32 %v2131_v18, %v1194_v9 }
 0x194   : > { %v1069_v12 = vpop.f32.mrb[62].mxu0  ;;  %v1197_v13 = vpop.f32.mrb[62].mxu1 }
 0x195   : > { %v1071_v16 = vpop.f32.mrb[63].mxu0  ;;  %v1199_v17 = vpop.f32.mrb[63].mxu1  ;;  %1497 = vst [vmem:[%s2138_s9 + $0xf0] sm:$0xff] %v1433_v14  ;;  %1529 = vst [vmem:[%s2138_s9 + $0x1f0] sm:$0xff] %v1465_v15  ;;  %v1434_v19 = vadd.f32 %v2131_v18, %v1069_v12  ;;  %v1466_v20 = vadd.f32 %v2131_v18, %v1197_v13 }
 0x197   : > { %1498 = vst [vmem:[%s2138_s9 + $0xf8] sm:$0xff] %v1434_v19  ;;  %1530 = vst [vmem:[%s2138_s9 + $0x1f8] sm:$0xff] %v1466_v20 }
 0x198 PF: > { %s13_s14 = sadd.s32 1, %s1933_s14   ;;  %s2281_s12 = smov %s1929_s13 }
 0x199   : > { %p10_p5 = scmp.ge.s32.totalorder %s13_s14, 6   ;;  %s2282_s13 = smov %s2284_s15 }
 0x19b   :  { %12 = sbr.rel (!%p10_p5) target bundleno = 2 (0x2), region = 76 }

</bundles_post_ra>
